<compile_context>
chip_gen: v7x
topology: tpu7x:2x2x1
jax: 0.10.0
libtpu: 0.0.40
codegen_flags: <defaults>
</compile_context>

<pallas_src>
import functools

import numpy as np
import jax
import jax.numpy as jnp
from jax.experimental import pallas as pl
from jax.experimental.pallas import tpu as pltpu


def _round_up(x, m):
    return (x + m - 1) // m * m


def _pick_tile(dim, unit, max_tile):
    """Largest multiple of `unit` that divides `dim` and is <= max_tile."""
    best = unit
    t = unit
    while t <= min(dim, max_tile):
        if dim % t == 0:
            best = t
        t += unit
    return best


def _hash_u32(x):
    """lowbias32 avalanche hash — plain uint32 VPU ops (xor/shift/mul)."""
    x = x ^ (x >> 16)
    x = x * np.uint32(0x7FEB352D)
    x = x ^ (x >> 15)
    x = x * np.uint32(0x846CA68B)
    x = x ^ (x >> 16)
    return x


def _linear_kernel(seed_ref, x_ref, w_ref, b_ref, o_ref, acc_ref, *,
                   act_fn, dropout_p, training, tm, tn, n_pad):
    # x_ref: (tm, tk)  w_ref: (tk, tn)  b_ref: (1, tn)  o_ref: (tm, tn)
    # acc_ref: (tm, tn) f32 scratch, persistent across the K grid axis.
    k = pl.program_id(2)
    k_last = pl.num_programs(2) - 1

    @pl.when(k == 0)
    def _init():
        acc_ref[...] = jnp.zeros_like(acc_ref)

    acc_ref[...] += jnp.dot(x_ref[...], w_ref[...],
                            preferred_element_type=jnp.float32)

    use_dropout = bool(training) and dropout_p > 0.0
    if use_dropout:
        # IMPORTANT: evaluate program ids / scalar reads OUTSIDE the pl.when
        # body.  Inside the cond branch, program_id has no lowering rule on
        # the CPU interpret path; here the values are captured as plain
        # operands of the cond.
        row0 = (pl.program_id(0) * tm).astype(jnp.uint32)
        col0 = (pl.program_id(1) * tn).astype(jnp.uint32)
        seed = seed_ref[0].astype(jnp.uint32) * np.uint32(0x9E3779B9)
        # 24-bit threshold -> signed int32 compare is safe everywhere.
        thresh24 = np.int32(min(int(round(dropout_p * float(1 << 24))),
                                (1 << 24) - 1))
        scale = jnp.float32(1.0 / (1.0 - dropout_p))

    @pl.when(k == k_last)
    def _epilogue():
        h = acc_ref[...] + b_ref[...].astype(jnp.float32)

        if use_dropout:
            rows = row0 + jax.lax.broadcasted_iota(
                jnp.int32, (tm, tn), 0).astype(jnp.uint32)
            cols = col0 + jax.lax.broadcasted_iota(
                jnp.int32, (tm, tn), 1).astype(jnp.uint32)
            idx = rows * np.uint32(n_pad) + cols
            bits = _hash_u32(idx ^ seed)
            bits24 = (bits >> np.uint32(8)).astype(jnp.int32)
            keep = bits24 >= thresh24
            h = jnp.where(keep, h * scale, jnp.zeros_like(h))

        o_ref[...] = act_fn(h).astype(o_ref.dtype)


def linear_forward(x, w_t, b=None, *, dropout_p=0.0, training=False,
                   act=jax.nn.relu, seed=0,
                   tm_max=256, tn_max=512, tk_max=512):
    """act(dropout(x @ w_t + b)).  x: [..., K], w_t: [K, N], b: [N] or None.

    `act` may be any JAX-traceable elementwise callable (relu, tanh, ...).
    """
    orig_shape = x.shape
    K = orig_shape[-1]
    N = w_t.shape[1]
    if b is None:  # use_bias=False in the PyTorch module
        b = jnp.zeros((N,), dtype=x.dtype)

    x2 = x.reshape(-1, K)
    M = x2.shape[0]

    # --- tile sizes & padding (wrapper pads, kernel stays aligned) ---------
    tm = min(tm_max, _round_up(M, 8))
    M_pad = _round_up(M, tm)

    N_pad = _round_up(N, 128)                 # lane-dense output
    tn = _pick_tile(N_pad, 128, tn_max)

    if K <= tk_max:
        tk, K_pad = K, K                      # single K step, full-dim block
    else:
        K_pad = _round_up(K, 128)
        tk = _pick_tile(K_pad, 128, tk_max)

    if (M_pad, K_pad) != (M, K):
        x2 = jnp.pad(x2, ((0, M_pad - M), (0, K_pad - K)))
    if (K_pad, N_pad) != tuple(w_t.shape):
        w_t = jnp.pad(w_t, ((0, K_pad - K), (0, N_pad - N)))
    b2 = jnp.pad(b, (0, N_pad - N)).reshape(1, N_pad)

    grid = (M_pad // tm, N_pad // tn, K_pad // tk)

    kernel = functools.partial(
        _linear_kernel, act_fn=act, dropout_p=float(dropout_p),
        training=bool(training), tm=tm, tn=tn, n_pad=N_pad)
    seed_arr = jnp.asarray([seed], dtype=jnp.int32)

    out = pl.pallas_call(
        kernel,
        out_shape=jax.ShapeDtypeStruct((M_pad, N_pad), x.dtype),
        grid_spec=pltpu.PrefetchScalarGridSpec(
            num_scalar_prefetch=1,
            grid=grid,
            in_specs=[
                # x tile: depends on (i, k) only
                pl.BlockSpec((tm, tk), lambda i, j, k, s: (i, k)),
                # weight tile: independent of the M axis (no re-fetch along i)
                pl.BlockSpec((tk, tn), lambda i, j, k, s: (k, j)),
                # bias strip
                pl.BlockSpec((1, tn), lambda i, j, k, s: (0, j)),
            ],
            out_specs=pl.BlockSpec((tm, tn), lambda i, j, k, s: (i, j)),
            scratch_shapes=[pltpu.VMEM((tm, tn), jnp.float32)],
        ),
        compiler_params=pltpu.CompilerParams(
            dimension_semantics=("parallel", "parallel", "arbitrary"),
            # well under v7x's 64 MiB physical VMEM; plenty for these tiles
            vmem_limit_bytes=32 * 1024 * 1024,
        ),
    )(seed_arr, x2, w_t, b2)

    out = out[:M, :N]
    return out.reshape(*orig_shape[:-1], N)


if __name__ == "__main__":
    # Small shapes consistent with the module: in_features=32, out_features=64.
    batch, seq, in_features, out_features = 2, 8, 32, 64
    key = jax.random.PRNGKey(0)
    kx, kw, kb = jax.random.split(key, 3)

    x = jax.random.normal(kx, (batch, seq, in_features), dtype=jnp.float32)
    # PyTorch-style init: W is (out, in); we store W.T = (in, out).
    bound = 1.0 / (in_features ** 0.5)
    w = jax.random.uniform(kw, (out_features, in_features),
                           minval=-bound, maxval=bound, dtype=jnp.float32)
    b = jax.random.uniform(kb, (out_features,),
                           minval=-bound, maxval=bound, dtype=jnp.float32)
    w_t = w.T

    # --- eval mode: dropout is identity; check against pure-JAX reference ---
    out_eval = linear_forward(x, w_t, b, dropout_p=0.5, training=False,
                              act=jax.nn.relu)
    out_eval = jax.block_until_ready(out_eval)
    ref_pre = jnp.einsum("bsk,kn->bsn", x, w_t) + b
    ref = jnp.maximum(ref_pre, 0.0)
    assert out_eval.shape == (batch, seq, out_features)
    assert jnp.allclose(out_eval, ref, atol=1e-5, rtol=1e-5)

    # --- training mode: fused in-kernel dropout (scaled by 1/(1-p)) ---------
    p = 0.5
    out_train = linear_forward(x, w_t, b, dropout_p=p, training=True,
                               act=jax.nn.relu, seed=123)
    out_train = jax.block_until_ready(out_train)
    assert out_train.shape == (batch, seq, out_features)
    # Each element is either dropped (0) or relu(pre / (1 - p)).
    kept_val = jnp.maximum(ref_pre / (1.0 - p), 0.0)
    ok = jnp.isclose(out_train, kept_val, atol=1e-5, rtol=1e-5) | (out_train == 0.0)
    assert bool(jnp.all(ok))
    # Dropout actually drops roughly p of the strictly-positive outputs.
    pos = kept_val > 1e-6
    num_pos = int(jnp.sum(pos))
    num_kept = int(jnp.sum(pos & (out_train > 0)))
    drop_frac = 1.0 - num_kept / max(num_pos, 1)
    assert 0.2 < drop_frac < 0.8, drop_frac

    print("KERNEL_OK")
</pallas_src>

<mosaic_0001>
module attributes {stable_mosaic.version = 11 : i64} {
  func.func @_linear_kernel(%arg0: i32, %arg1: i32, %arg2: i32, %arg3: memref<1xi32, #tpu.memory_space<smem>>, %arg4: memref<16x32xf32, #tpu.memory_space<vmem>>, %arg5: memref<32x128xf32, #tpu.memory_space<vmem>>, %arg6: memref<1x128xf32, #tpu.memory_space<vmem>>, %arg7: memref<16x128xf32, #tpu.memory_space<vmem>>, %arg8: memref<16x128xf32, #tpu.memory_space<vmem>>) attributes {dimension_semantics = [#tpu.dimension_semantics<parallel>, #tpu.dimension_semantics<parallel>, #tpu.dimension_semantics<arbitrary>], iteration_bounds = array<i64: 1, 1, 1>, scalar_prefetch = 1 : i64, scratch_operands = 1 : i64, tpu.core_type = #tpu.core_type<tc>, window_params = [{transform_indices = @transform_0, window_bounds = array<i64: 16, 32>}, {transform_indices = @transform_1, window_bounds = array<i64: 32, 128>}, {transform_indices = @transform_2, window_bounds = array<i64: 1, 128>}, {transform_indices = @transform_3, window_bounds = array<i64: 16, 128>}]} {
    %c0_i32 = arith.constant 0 : i32
    %0 = arith.cmpi eq, %arg2, %c0_i32 : i32
    %1 = arith.extui %0 : i1 to i32
    %c0_i32_0 = arith.constant 0 : i32
    %2 = arith.cmpi ne, %1, %c0_i32_0 : i32
    scf.if %2 {
      %cst_10 = arith.constant 0.000000e+00 : f32
      %12 = vector.broadcast %cst_10 : f32 to vector<16x128xf32>
      %c0_11 = arith.constant 0 : index
      %c0_12 = arith.constant 0 : index
      %13 = vector.load %arg8[%c0_11, %c0_12] : memref<16x128xf32, #tpu.memory_space<vmem>>, vector<16x128xf32>
      tpu.vector_store %arg8[%c0_11, %c0_12], %12 {strides = array<i32>} : memref<16x128xf32, #tpu.memory_space<vmem>>, vector<16x128xf32>,
    } else {
    }
    %c0 = arith.constant 0 : index
    %c0_1 = arith.constant 0 : index
    %3 = vector.load %arg8[%c0, %c0_1] : memref<16x128xf32, #tpu.memory_space<vmem>>, vector<16x128xf32>
    %c0_2 = arith.constant 0 : index
    %c0_3 = arith.constant 0 : index
    %4 = vector.load %arg4[%c0_2, %c0_3] : memref<16x32xf32, #tpu.memory_space<vmem>>, vector<16x32xf32>
    %c0_4 = arith.constant 0 : index
    %c0_5 = arith.constant 0 : index
    %5 = vector.load %arg5[%c0_4, %c0_5] : memref<32x128xf32, #tpu.memory_space<vmem>>, vector<32x128xf32>
    %cst = arith.constant dense<0.000000e+00> : vector<16x128xf32>
    %6 = tpu.matmul %4, %5, %cst {dimension_numbers = #tpu.dot_dimension_numbers<[1], [0], [0], [1], [0, 0, 1, 1], [], []>} : vector<16x32xf32>, vector<32x128xf32>, vector<16x128xf32> -> vector<16x128xf32>
    %7 = arith.addf %3, %6 : vector<16x128xf32>
    %c0_6 = arith.constant 0 : index
    %c0_7 = arith.constant 0 : index
    %8 = vector.load %arg8[%c0_6, %c0_7] : memref<16x128xf32, #tpu.memory_space<vmem>>, vector<16x128xf32>
    tpu.vector_store %arg8[%c0_6, %c0_7], %7 {strides = array<i32>} : memref<16x128xf32, #tpu.memory_space<vmem>>, vector<16x128xf32>,
    %c0_i32_8 = arith.constant 0 : i32
    %9 = arith.cmpi eq, %arg2, %c0_i32_8 : i32
    %10 = arith.extui %9 : i1 to i32
    %c0_i32_9 = arith.constant 0 : i32
    %11 = arith.cmpi ne, %10, %c0_i32_9 : i32
    scf.if %11 {
      %c0_10 = arith.constant 0 : index
      %c0_11 = arith.constant 0 : index
      %12 = vector.load %arg8[%c0_10, %c0_11] : memref<16x128xf32, #tpu.memory_space<vmem>>, vector<16x128xf32>
      %c0_12 = arith.constant 0 : index
      %c0_13 = arith.constant 0 : index
      %13 = vector.load %arg6[%c0_12, %c0_13] : memref<1x128xf32, #tpu.memory_space<vmem>>, vector<1x128xf32>
      %14 = vector.broadcast %13 : vector<1x128xf32> to vector<16x128xf32>
      %15 = arith.addf %12, %14 : vector<16x128xf32>
      %cst_14 = arith.constant 0.000000e+00 : f32
      %16 = vector.broadcast %cst_14 : f32 to vector<16x128xf32>
      %17 = arith.maximumf %15, %16 : vector<16x128xf32>
      %c0_15 = arith.constant 0 : index
      %c0_16 = arith.constant 0 : index
      %18 = vector.load %arg7[%c0_15, %c0_16] : memref<16x128xf32, #tpu.memory_space<vmem>>, vector<16x128xf32>
      tpu.vector_store %arg7[%c0_15, %c0_16], %17 {strides = array<i32>} : memref<16x128xf32, #tpu.memory_space<vmem>>, vector<16x128xf32>,
    } else {
    }
    return
  }
  func.func @transform_0(%arg0: i32, %arg1: i32, %arg2: i32, %arg3: memref<1xi32, #tpu.memory_space<smem>>) -> (i32, i32) {
    %c0_i32 = arith.constant 0 : i32
    return %arg0, %arg2 : i32, i32
  }
  func.func @transform_1(%arg0: i32, %arg1: i32, %arg2: i32, %arg3: memref<1xi32, #tpu.memory_space<smem>>) -> (i32, i32) {
    %c0_i32 = arith.constant 0 : i32
    return %arg2, %arg1 : i32, i32
  }
  func.func @transform_2(%arg0: i32, %arg1: i32, %arg2: i32, %arg3: memref<1xi32, #tpu.memory_space<smem>>) -> (i32, i32) {
    %c0_i32 = arith.constant 0 : i32
    %c0_i32_0 = arith.constant 0 : i32
    return %c0_i32, %arg1 : i32, i32
  }
  func.func @transform_3(%arg0: i32, %arg1: i32, %arg2: i32, %arg3: memref<1xi32, #tpu.memory_space<smem>>) -> (i32, i32) {
    %c0_i32 = arith.constant 0 : i32
    return %arg0, %arg1 : i32, i32
  }
}

</mosaic_0001>

<bundles_post_ra>
// kernel: tpu_custom_call.1
= control target key start
LH: loop header
LB: loop body
LE: loop exit
PB: predicated region body
PF: predicated region fallthrough
CT: control target
= control target key end

     0   :  { %10 = vsyncpa [#allocation6], 0  ;;  %s364_s0 = inlined_call_operand.<no memory space> [shape: s32[1], index: 0, kind: input, shape index: {}]   ;;  %s365_s1 = inlined_call_operand.hbm [shape: f32[16,32], index: 1, kind: input, shape index: {}]   ;;  %s366_s2 = inlined_call_operand.hbm [shape: f32[32,128], index: 2, kind: input, shape index: {}]   ;;  %s367_s3 = inlined_call_operand.vmem [shape: f32[1,128], index: 3, kind: input, shape index: {}]   ;;  %s368_s4 = inlined_call_operand.hbm [shape: f32[16,128], index: 4, kind: output, shape index: {}]  }
   0x1   :  { %11 = vsyncpa [#allocation9], 0 }
   0x2   :  { %12 = vsyncpa [#allocation7], 0  ;;  %s286_s15 = smov [#allocation5]   ;;  %s214_s18 = scalar_lea.hbm %s365_s1, 256 }
   0x3   :  { %s18_s16 = sshll.u32 %s286_s15, 4  ;;  %p215_p0 = scmp.ne.s32.totalorder %s365_s1, %s214_s18  ;;  %s19_s16 = int_to_ptr.vmem [resolvable:$true] %s18_s16 }
   0x4   :  { %p218_p1 = scmp.lt.u32.totalorder %s214_s18, %s365_s1 }
   0x6   :  { %p220_p2 = pnand %p218_p1, %p215_p0 }
   0x8   :  { %223 = shalt.err (!%p220_p2)
}
   0x9   :  { %s224_s23 = scalar_lea.vmem %s19_s16, 256  ;;  %p229_p4 = scmp.lt.s32.totalorder %s19_s16, %s19_s16 }
   0xa   :  { %p225_p3 = scmp.ne.s32.totalorder %s19_s16, %s224_s23  ;;  %p230_p5 = scmp.lt.s32.totalorder %s224_s23, %s224_s23 }
   0xc   :  { %p231_p6 = por %p230_p5, %p229_p4 }
   0xe   :  { %p232_p7 = pnand %p231_p6, %p225_p3 }
  0x10   :  { %235 = shalt.err (!%p232_p7)
}
  0x11   :  { %s287_s24 = smov 128   ;;  %s288_s25 = smov 8  }
  0x12   :  { %24 = dma.hbm_to_vmem [thread:$0]  %s365_s1, 256, %s19_s16, [#allocation6], %s287_s24, %s287_s24, %s288_s25  }
  0x13   :  { %s289_s28 = smov [#allocation8]   ;;  %s236_s6 = scalar_lea.hbm %s366_s2, 512 }
  0x14   :  { %s30_s29 = sshll.u32 %s289_s28, 4  ;;  %p237_p8 = scmp.ne.s32.totalorder %s366_s2, %s236_s6  ;;  %s31_s29 = int_to_ptr.vmem [resolvable:$true] %s30_s29 }
  0x15   :  { %p240_p9 = scmp.lt.u32.totalorder %s236_s6, %s366_s2 }
  0x17   :  { %p242_p10 = pnand %p240_p9, %p237_p8 }
  0x19   :  { %245 = shalt.err (!%p242_p10)
}
  0x1a   :  { %s246_s11 = scalar_lea.vmem %s31_s29, 512  ;;  %p251_p12 = scmp.lt.s32.totalorder %s31_s29, %s31_s29 }
  0x1b   :  { %p247_p11 = scmp.ne.s32.totalorder %s31_s29, %s246_s11  ;;  %p252_p13 = scmp.lt.s32.totalorder %s246_s11, %s246_s11 }
  0x1d   :  { %p253_p0 = por %p252_p13, %p251_p12 }
  0x1f   :  { %p254_p1 = pnand %p253_p0, %p247_p11 }
  0x21   :  { %257 = shalt.err (!%p254_p1)
}
  0x22   :  { %36 = dma.hbm_to_vmem [thread:$0]  %s366_s2, 512, %s31_s29, [#allocation9], %s287_s24, %s287_s24, %s288_s25  }
  0x23   :  { %280 = dma.done.wait [#allocation6], 256  }
  0x24   :  { %281 = vsyncadd [#allocation6], 4294967040 }
  0x25   :  { %282 = dma.done.wait [#allocation9], 512  }
  0x26   :  { %283 = vsyncadd [#allocation9], 4294966784  ;;  %vm59_vm0 = vcmask 261120   ;;  %v55_v0 = vld [vmem:[#allocation8] sm:$0xff]  ;;  %v56_v1 = vld [vmem:[#allocation8 + $0x8] sm:$0xff]  ;;  %s290_s14 = smov [#allocation10]  }
  0x27   :  { %v57_v2 = vld [vmem:[#allocation8 + $0x10] sm:$0xff]  ;;  %v201_v3 = vpack.c.bf16 %v56_v1, %v55_v0  ;;  %v58_v4 = vld [vmem:[#allocation8 + $0x18] sm:$0xff]  ;;  %s168_s15 = sshll.u32 %s290_s14, 4  ;;  %s169_s15 = int_to_ptr.vmem [resolvable:$true] %s168_s15 }
  0x28   :  { %v53_v5 = vld [vmem:[#allocation5] sm:$0xff]  ;;  %v205_v6 = vpack.c.bf16 %v58_v4, %v57_v2  ;;  %v54_v7 = vld [vmem:[#allocation5 + $0x8] sm:$0xff]  ;;  %s258_s16 = scalar_lea.vmem %s169_s15, 256  ;;  %p263_p3 = scmp.lt.s32.totalorder %s169_s15, %s169_s15 }
  0x29   :  { %198 = vmatprep.mubr.msk.f32.mxu0 %vm59_vm0, %v53_v5  ;;  %202 = vmatprep.subr.bf16.mxu0 %v201_v3  ;;  %v183_v8 = vld [vmem:[%s367_s3] ss:$0 sm:$0xff]  ;;  %p259_p2 = scmp.ne.s32.totalorder %s169_s15, %s258_s16  ;;  %p264_p4 = scmp.lt.s32.totalorder %s258_s16, %s258_s16 }
  0x2a   :  { %204 = vmatpush3.bf16.msra.mxu0 %v201_v3 }
  0x2b   :  { %206 = vmatprep.subr.bf16.mxu0 %v205_v6  ;;  %p265_p5 = por %p264_p4, %p263_p3 }
  0x2d   :  { %p266_p6 = pnand %p265_p5, %p259_p2 }
  0x2e   :  { %208 = vmatpush3.bf16.msra.mxu0 %v205_v6 }
  0x31   :  { %199 = vmatmul.mubr.msk.f32.vlgmr.msra.gmra.mrb[0].mxu0 %vm59_vm0, %v54_v7 }
 0x104   :  { %v200_v9 = vpop.f32.mrb[0].mxu0 }
 0x105   :  { %v158_v10 = vadd.f32 %v200_v9, %v183_v8  ;;  %v132_v11 = vpop.f32.mrb[1].mxu0 }
 0x106   :  { %v157_v12 = vadd.f32 %v183_v8, %v132_v11 }
 0x107   :  { %v160_v13 = vmax.f32 %v158_v10, 0.0 }
 0x108   :  { %v159_v14 = vmax.f32 %v157_v12, 0.0 }
 0x109   :  { %162 = vst [vmem:[#allocation10 + $0x8] sm:$0xff] %v160_v13 }
 0x10a   :  { %161 = vst [vmem:[#allocation10] sm:$0xff] %v159_v14 }
 0x10b   :  { %269 = shalt.err (!%p266_p6)
}
 0x10c   :  { %s270_s0 = scalar_lea.hbm %s368_s4, 256 }
 0x10d   :  { %p271_p7 = scmp.ne.s32.totalorder %s368_s4, %s270_s0  ;;  %p274_p8 = scmp.lt.u32.totalorder %s270_s0, %s368_s4 }
 0x10f   :  { %p276_p9 = pnand %p274_p8, %p271_p7 }
 0x111   :  { %279 = shalt.err (!%p276_p9)
}
 0x112   :  { %174 = dma.vmem_to_hbm [thread:$0]  %s169_s15, 256, %s368_s4, [#allocation7], %s287_s24, %s287_s24, %s288_s25  }
 0x113   :  { %284 = dma.done.wait [#allocation7], 256  }
 0x114   :  { %285 = vsyncadd [#allocation7], 4294967040 }
 0x115   :  { %178 = vsyncpa [#allocation6], 1 }
 0x116   :  { %179 = vsyncpa [#allocation9], 1 }
 0x117   :  { %180 = vsyncpa [#allocation7], 1 }

</bundles_post_ra>
